<compile_context>
chip_gen: v5e
topology: v5e:2x2
jax: 0.10.0
libtpu: 0.0.40
codegen_flags: <defaults>
</compile_context>

<pallas_src>
import functools

import jax
import jax.numpy as jnp
from jax.experimental import pallas as pl
from jax.experimental.pallas import tpu as pltpu


# ---------------------------------------------------------------------------
# Kernels (batch on the lane axis: activations are [feature, tile_b])
# ---------------------------------------------------------------------------

def _mlp_lane_dense(x, w1T_ref, b1_ref, w2T_ref, b2_ref, woT_ref, boT_ref, out_refs):
    # layer 1: [Hp, D] @ [D, tile] -> [Hp, tile]   (f32 accumulation on the MXU)
    h = jnp.dot(w1T_ref[...], x, preferred_element_type=jnp.float32) + b1_ref[...]
    h = jnp.maximum(h, 0.0).astype(w2T_ref.dtype)

    # layer 2: [Hp, Hp] @ [Hp, tile] -> [Hp, tile]
    h = jnp.dot(w2T_ref[...], h, preferred_element_type=jnp.float32) + b2_ref[...]
    h = jnp.maximum(h, 0.0).astype(woT_ref.dtype)

    # output layer: [O, Hp] @ [Hp, tile] -> [O, tile], already lane-dense
    out = jnp.dot(woT_ref[...], h, preferred_element_type=jnp.float32) + boT_ref[...]

    # separate full-width row stores (one [1, tile] output per decoded quantity)
    for o, out_ref in enumerate(out_refs):
        out_ref[...] = out[o:o + 1, :]


def _kernel_nomask(x_ref, w1T_ref, b1_ref, w2T_ref, b2_ref, woT_ref, boT_ref, *out_refs):
    x = x_ref[...].astype(w1T_ref.dtype)
    _mlp_lane_dense(x, w1T_ref, b1_ref, w2T_ref, b2_ref, woT_ref, boT_ref, out_refs)


def _kernel_masked(binary_mask, x_ref, m_ref, w1T_ref, b1_ref, w2T_ref, b2_ref,
                   woT_ref, boT_ref, *out_refs):
    x = x_ref[...]
    m = m_ref[...]
    if binary_mask:
        # int8 mask streamed from HBM (half the bytes of bf16, quarter of f32)
        x = jnp.where(m != 0, x, jnp.zeros_like(x))
    else:
        # float per-sample mask: multiply in the compute dtype directly
        x = x * m
    x = x.astype(w1T_ref.dtype)
    _mlp_lane_dense(x, w1T_ref, b1_ref, w2T_ref, b2_ref, woT_ref, boT_ref, out_refs)


# ---------------------------------------------------------------------------
# Wrapper
# ---------------------------------------------------------------------------

def _round_up(x, m):
    return ((x + m - 1) // m) * m


def _cdiv(a, b):
    return (a + b - 1) // b


def _tensorcores_per_chip():
    """TensorCores reachable by a 'parallel' grid axis on one chip (best effort)."""
    try:
        kind = jax.devices()[0].device_kind.lower()
    except Exception:
        return 1
    if any(tag in kind for tag in ("v4", "v5p", "v7", "7x")):
        return 2
    return 1


def scaler_decoder_forward(z, params, scaler_latent_mask=None, *,
                           tile_b=8192, compute_dtype=jnp.bfloat16):
    """z: [B, 1, D]. Returns dict with 'scaler' [B] (and 'bias' [B] when O > 1), float32.

    Note: compute_dtype=bfloat16 by default (f32 MXU accumulation); pass
    compute_dtype=jnp.float32 for bit-level parity with the PyTorch module.
    """
    B, one, D = z.shape
    assert one == 1
    latent = z[:, 0]                          # [B, D]

    w1 = jnp.asarray(params["w1"])            # [D, H]
    b1 = jnp.asarray(params["b1"]).reshape(1, -1)   # [1, H]
    w2 = jnp.asarray(params["w2"])            # [H, H]
    b2 = jnp.asarray(params["b2"]).reshape(1, -1)   # [1, H]
    wo = jnp.asarray(params["wo"])            # [H, O]
    bo = jnp.asarray(params["bo"]).reshape(1, -1)   # [1, O]
    H = w1.shape[1]
    O = wo.shape[1]
    assert O >= 1

    # ---- mask handling -------------------------------------------------------
    mask_mode = "none"          # "none" | "mul" (float) | "binary" (int8 select)
    mask_t = None
    mask = scaler_latent_mask
    if mask is not None:
        mask = jnp.asarray(mask)
        if mask.ndim == 1 or (mask.ndim == 2 and mask.shape[0] == 1):
            # per-feature mask ([D] or [1, D]): fold into w1 -> zero extra HBM traffic.
            mvec = mask.reshape(-1).astype(w1.dtype)
            w1 = w1 * mvec[:, None]
        else:
            m2 = jnp.broadcast_to(mask, (B, D))
            if jnp.issubdtype(m2.dtype, jnp.floating):
                mask_mode = "mul"
                mask_t = m2.T.astype(compute_dtype)       # [D, B]
            else:
                mask_mode = "binary"
                mask_t = m2.T.astype(jnp.int8)            # [D, B], 1 byte/elem

    # ---- pad hidden width to a full 128-lane multiple (exact: padding is 0) ----
    Hp = _round_up(H, 128)
    if Hp != H:
        w1 = jnp.pad(w1, ((0, 0), (0, Hp - H)))
        b1 = jnp.pad(b1, ((0, 0), (0, Hp - H)))
        w2 = jnp.pad(w2, ((0, Hp - H), (0, Hp - H)))
        b2 = jnp.pad(b2, ((0, 0), (0, Hp - H)))
        wo = jnp.pad(wo, ((0, Hp - H), (0, 0)))

    # weights as LHS operands (batch-on-lanes orientation)
    w1T = w1.T.astype(compute_dtype)          # [Hp, D]
    w2T = w2.T.astype(compute_dtype)          # [Hp, Hp]
    woT = wo.T.astype(compute_dtype)          # [O, Hp]
    b1T = b1.T.astype(jnp.float32)            # [Hp, 1]
    b2T = b2.T.astype(jnp.float32)            # [Hp, 1]
    boT = bo.T.astype(jnp.float32)            # [O, 1]

    # ---- batch tiling: big tiles, bounded padding, device-aware splitting ------
    Bp0 = _round_up(B, 128)
    n_tc = _tensorcores_per_chip()
    target = max(128, _round_up(tile_b, 128))
    steps = _cdiv(Bp0, target)
    if n_tc > 1:
        # dual-TC chips (v7x, megacore): keep the parallel grid a multiple of #TC
        steps = _round_up(max(steps, n_tc), n_tc)
    tile = max(128, _round_up(_cdiv(Bp0, steps), 128))
    Bp = tile * steps
    grid = (steps,)

    # ---- cast, transpose (batch on lanes) and pad the batch --------------------
    latent_t = latent.T.astype(compute_dtype)                # [D, B]
    if Bp != B:
        latent_t = jnp.pad(latent_t, ((0, 0), (0, Bp - B)))
        if mask_t is not None:
            mask_t = jnp.pad(mask_t, ((0, 0), (0, Bp - B)))

    # ---- VMEM budget (only raise the scoped limit when actually needed) --------
    cdt_bytes = jnp.dtype(compute_dtype).itemsize
    mask_bytes = 0 if mask_t is None else jnp.dtype(mask_t.dtype).itemsize
    est = 2 * D * tile * cdt_bytes                            # x tiles (double-buffered)
    est += 2 * D * tile * mask_bytes                          # mask tiles
    est += 2 * ((Hp * D + Hp * Hp + O * Hp) * cdt_bytes + (2 * Hp + O) * 4)   # weights/biases
    est += 2 * O * tile * 4                                   # output tiles
    est += 2 * Hp * tile * 4                                  # f32 intermediates (internal)
    vmem_limit = None
    if est > (24 << 20):
        vmem_limit = int(min(est * 5 // 4 + (4 << 20), 56 << 20))

    # ---- specs ------------------------------------------------------------------
    full = lambda i: (0, 0)        # weights/biases: same block every step -> stay resident
    x_spec = pl.BlockSpec((D, tile), lambda i: (0, i))
    weight_specs = [
        pl.BlockSpec((Hp, D), full),     # w1T
        pl.BlockSpec((Hp, 1), full),     # b1T
        pl.BlockSpec((Hp, Hp), full),    # w2T
        pl.BlockSpec((Hp, 1), full),     # b2T
        pl.BlockSpec((O, Hp), full),     # woT
        pl.BlockSpec((O, 1), full),      # boT
    ]
    out_shape = tuple(jax.ShapeDtypeStruct((1, Bp), jnp.float32) for _ in range(O))
    out_specs = tuple(pl.BlockSpec((1, tile), lambda i: (0, i)) for _ in range(O))

    if mask_mode == "none":
        kernel = _kernel_nomask
        in_specs = [x_spec] + weight_specs
        operands = (latent_t, w1T, b1T, w2T, b2T, woT, boT)
    else:
        kernel = functools.partial(_kernel_masked, mask_mode == "binary")
        m_spec = pl.BlockSpec((D, tile), lambda i: (0, i))
        in_specs = [x_spec, m_spec] + weight_specs
        operands = (latent_t, mask_t, w1T, b1T, w2T, b2T, woT, boT)

    outs = pl.pallas_call(
        kernel,
        out_shape=out_shape,
        grid_spec=pltpu.PrefetchScalarGridSpec(
            num_scalar_prefetch=0,
            grid=grid,
            in_specs=in_specs,
            out_specs=out_specs,
        ),
        compiler_params=pltpu.CompilerParams(
            dimension_semantics=("parallel",),
            vmem_limit_bytes=vmem_limit,
        ),
    )(*operands)

    ret = {"scaler": outs[0][0, :B]}
    if O > 1:
        ret["bias"] = outs[1][0, :B]
    return ret


# ---------------------------------------------------------------------------
# Reference + test
# ---------------------------------------------------------------------------

def _reference_forward(z, params, mask):
    x = z[:, 0]
    if mask is not None:
        x = x * mask
    h = jnp.maximum(x @ params["w1"] + params["b1"], 0.0)
    h = jnp.maximum(h @ params["w2"] + params["b2"], 0.0)
    out = h @ params["wo"] + params["bo"]
    return out[..., 0], out[..., 1]


def _init_params(key, D, H, O):
    ks = jax.random.split(key, 6)
    scale = 0.1
    return {
        "w1": scale * jax.random.normal(ks[0], (D, H), jnp.float32),
        "b1": scale * jax.random.normal(ks[1], (1, H), jnp.float32),
        "w2": scale * jax.random.normal(ks[2], (H, H), jnp.float32),
        "b2": scale * jax.random.normal(ks[3], (1, H), jnp.float32),
        "wo": scale * jax.random.normal(ks[4], (H, O), jnp.float32),
        "bo": scale * jax.random.normal(ks[5], (1, O), jnp.float32),
    }


if __name__ == "__main__":
    # Small shapes; B deliberately not a multiple of 128 to exercise bounded padding.
    B, D, H, O = 300, 32, 64, 2
    key = jax.random.PRNGKey(0)
    kz, km1, km2, kp = jax.random.split(key, 4)

    z = jax.random.normal(kz, (B, 1, D), jnp.float32)
    params = _init_params(kp, D, H, O)

    # Case 1: per-sample float mask [B, D], f32 compute (tight tolerance).
    mask_bd = (jax.random.uniform(km1, (B, D)) > 0.2).astype(jnp.float32)
    ret = scaler_decoder_forward(z, params, mask_bd, compute_dtype=jnp.float32)
    jax.block_until_ready(ret)
    ref_s, ref_b = _reference_forward(z, params, mask_bd)
    assert jnp.allclose(ret["scaler"], ref_s, atol=1e-4, rtol=1e-4)
    assert jnp.allclose(ret["bias"], ref_b, atol=1e-4, rtol=1e-4)

    # Case 2: per-sample *boolean* mask -> streamed as int8, select in-kernel (f32 compute).
    mask_bool = jax.random.uniform(km1, (B, D)) > 0.2
    ret1b = scaler_decoder_forward(z, params, mask_bool, compute_dtype=jnp.float32)
    jax.block_until_ready(ret1b)
    ref_s1b, ref_b1b = _reference_forward(z, params, mask_bool.astype(jnp.float32))
    assert jnp.allclose(ret1b["scaler"], ref_s1b, atol=1e-4, rtol=1e-4)
    assert jnp.allclose(ret1b["bias"], ref_b1b, atol=1e-4, rtol=1e-4)

    # Case 3: per-feature mask [D] folded into w1, bf16 compute (loose tolerance).
    mask_d = (jax.random.uniform(km2, (D,)) > 0.2).astype(jnp.float32)
    ret2 = scaler_decoder_forward(z, params, mask_d)  # default bf16
    jax.block_until_ready(ret2)
    ref_s2, ref_b2 = _reference_forward(z, params, mask_d)
    assert jnp.allclose(ret2["scaler"], ref_s2, atol=5e-2, rtol=5e-2)
    assert jnp.allclose(ret2["bias"], ref_b2, atol=5e-2, rtol=5e-2)

    # Case 4: rank-2 per-feature mask [1, D] is folded too (no [B, D] broadcast streamed).
    ret2b = scaler_decoder_forward(z, params, mask_d[None, :])
    jax.block_until_ready(ret2b)
    assert jnp.allclose(ret2b["scaler"], ref_s2, atol=5e-2, rtol=5e-2)
    assert jnp.allclose(ret2b["bias"], ref_b2, atol=5e-2, rtol=5e-2)

    # Case 5: no mask, bf16 compute (nothing extra streamed).
    ret3 = scaler_decoder_forward(z, params, None)
    jax.block_until_ready(ret3)
    ref_s3, ref_b3 = _reference_forward(z, params, None)
    assert jnp.allclose(ret3["scaler"], ref_s3, atol=5e-2, rtol=5e-2)
    assert jnp.allclose(ret3["bias"], ref_b3, atol=5e-2, rtol=5e-2)

    # TODO(synk): PerfTimer / in-place ret-dict mutation in the original module are host-side glue, not kernel work.
    print("KERNEL_OK")
</pallas_src>

<mosaic_0001>
module attributes {stable_mosaic.version = 11 : i64} {
  func.func @_kernel_masked(%arg0: i32, %arg1: memref<32x384xf32, #tpu.memory_space<vmem>>, %arg2: memref<32x384xf32, #tpu.memory_space<vmem>>, %arg3: memref<128x32xf32, #tpu.memory_space<vmem>>, %arg4: memref<128x1xf32, #tpu.memory_space<vmem>>, %arg5: memref<128x128xf32, #tpu.memory_space<vmem>>, %arg6: memref<128x1xf32, #tpu.memory_space<vmem>>, %arg7: memref<2x128xf32, #tpu.memory_space<vmem>>, %arg8: memref<2x1xf32, #tpu.memory_space<vmem>>, %arg9: memref<1x384xf32, #tpu.memory_space<vmem>>, %arg10: memref<1x384xf32, #tpu.memory_space<vmem>>) attributes {dimension_semantics = [#tpu.dimension_semantics<parallel>], iteration_bounds = array<i64: 1>, scalar_prefetch = 0 : i64, scratch_operands = 0 : i64, tpu.core_type = #tpu.core_type<tc>, window_params = [{transform_indices = @transform_0, window_bounds = array<i64: 32, 384>}, {transform_indices = @transform_1, window_bounds = array<i64: 32, 384>}, {pipeline_mode = #tpu.pipeline_mode<synchronous>, transform_indices = @transform_2, window_bounds = array<i64: 128, 32>}, {pipeline_mode = #tpu.pipeline_mode<synchronous>, transform_indices = @transform_3, window_bounds = array<i64: 128, 1>}, {pipeline_mode = #tpu.pipeline_mode<synchronous>, transform_indices = @transform_4, window_bounds = array<i64: 128, 128>}, {pipeline_mode = #tpu.pipeline_mode<synchronous>, transform_indices = @transform_5, window_bounds = array<i64: 128, 1>}, {pipeline_mode = #tpu.pipeline_mode<synchronous>, transform_indices = @transform_6, window_bounds = array<i64: 2, 128>}, {pipeline_mode = #tpu.pipeline_mode<synchronous>, transform_indices = @transform_7, window_bounds = array<i64: 2, 1>}, {transform_indices = @transform_8, window_bounds = array<i64: 1, 384>}, {transform_indices = @transform_9, window_bounds = array<i64: 1, 384>}]} {
    %c0 = arith.constant 0 : index
    %c0_0 = arith.constant 0 : index
    %0 = vector.load %arg1[%c0, %c0_0] : memref<32x384xf32, #tpu.memory_space<vmem>>, vector<32x384xf32>
    %c0_1 = arith.constant 0 : index
    %c0_2 = arith.constant 0 : index
    %1 = vector.load %arg2[%c0_1, %c0_2] : memref<32x384xf32, #tpu.memory_space<vmem>>, vector<32x384xf32>
    %2 = arith.mulf %0, %1 : vector<32x384xf32>
    %c0_3 = arith.constant 0 : index
    %c0_4 = arith.constant 0 : index
    %3 = vector.load %arg3[%c0_3, %c0_4] : memref<128x32xf32, #tpu.memory_space<vmem>>, vector<128x32xf32>
    %cst = arith.constant dense<0.000000e+00> : vector<128x384xf32>
    %4 = tpu.matmul %3, %2, %cst {dimension_numbers = #tpu.dot_dimension_numbers<[1], [0], [0], [1], [0, 0, 1, 1], [], []>} : vector<128x32xf32>, vector<32x384xf32>, vector<128x384xf32> -> vector<128x384xf32>
    %c0_5 = arith.constant 0 : index
    %c0_6 = arith.constant 0 : index
    %5 = vector.load %arg4[%c0_5, %c0_6] : memref<128x1xf32, #tpu.memory_space<vmem>>, vector<128x1xf32>
    %6 = vector.broadcast %5 : vector<128x1xf32> to vector<128x384xf32>
    %7 = arith.addf %4, %6 : vector<128x384xf32>
    %cst_7 = arith.constant 0.000000e+00 : f32
    %8 = vector.broadcast %cst_7 : f32 to vector<128x384xf32>
    %9 = arith.maximumf %7, %8 : vector<128x384xf32>
    %c0_8 = arith.constant 0 : index
    %c0_9 = arith.constant 0 : index
    %10 = vector.load %arg5[%c0_8, %c0_9] : memref<128x128xf32, #tpu.memory_space<vmem>>, vector<128x128xf32>
    %cst_10 = arith.constant dense<0.000000e+00> : vector<128x384xf32>
    %11 = tpu.matmul %10, %9, %cst_10 {dimension_numbers = #tpu.dot_dimension_numbers<[1], [0], [0], [1], [0, 0, 1, 1], [], []>} : vector<128x128xf32>, vector<128x384xf32>, vector<128x384xf32> -> vector<128x384xf32>
    %c0_11 = arith.constant 0 : index
    %c0_12 = arith.constant 0 : index
    %12 = vector.load %arg6[%c0_11, %c0_12] : memref<128x1xf32, #tpu.memory_space<vmem>>, vector<128x1xf32>
    %13 = vector.broadcast %12 : vector<128x1xf32> to vector<128x384xf32>
    %14 = arith.addf %11, %13 : vector<128x384xf32>
    %cst_13 = arith.constant 0.000000e+00 : f32
    %15 = vector.broadcast %cst_13 : f32 to vector<128x384xf32>
    %16 = arith.maximumf %14, %15 : vector<128x384xf32>
    %c0_14 = arith.constant 0 : index
    %c0_15 = arith.constant 0 : index
    %17 = vector.load %arg7[%c0_14, %c0_15] : memref<2x128xf32, #tpu.memory_space<vmem>>, vector<2x128xf32>
    %cst_16 = arith.constant dense<0.000000e+00> : vector<2x384xf32>
    %18 = tpu.matmul %17, %16, %cst_16 {dimension_numbers = #tpu.dot_dimension_numbers<[1], [0], [0], [1], [0, 0, 1, 1], [], []>} : vector<2x128xf32>, vector<128x384xf32>, vector<2x384xf32> -> vector<2x384xf32>
    %c0_17 = arith.constant 0 : index
    %c0_18 = arith.constant 0 : index
    %19 = vector.load %arg8[%c0_17, %c0_18] : memref<2x1xf32, #tpu.memory_space<vmem>>, vector<2x1xf32>
    %20 = vector.broadcast %19 : vector<2x1xf32> to vector<2x384xf32>
    %21 = arith.addf %18, %20 : vector<2x384xf32>
    %22 = vector.extract_strided_slice %21 {offsets = [0, 0], sizes = [1, 384], strides = [1, 1]} : vector<2x384xf32> to vector<1x384xf32>
    %c0_19 = arith.constant 0 : index
    %c0_20 = arith.constant 0 : index
    %23 = vector.load %arg9[%c0_19, %c0_20] : memref<1x384xf32, #tpu.memory_space<vmem>>, vector<1x384xf32>
    tpu.vector_store %arg9[%c0_19, %c0_20], %22 {strides = array<i32>} : memref<1x384xf32, #tpu.memory_space<vmem>>, vector<1x384xf32>,
    %24 = vector.extract_strided_slice %21 {offsets = [1, 0], sizes = [1, 384], strides = [1, 1]} : vector<2x384xf32> to vector<1x384xf32>
    %c0_21 = arith.constant 0 : index
    %c0_22 = arith.constant 0 : index
    %25 = vector.load %arg10[%c0_21, %c0_22] : memref<1x384xf32, #tpu.memory_space<vmem>>, vector<1x384xf32>
    tpu.vector_store %arg10[%c0_21, %c0_22], %24 {strides = array<i32>} : memref<1x384xf32, #tpu.memory_space<vmem>>, vector<1x384xf32>,
    return
  }
  func.func @transform_0(%arg0: i32) -> (i32, i32) {
    %c0_i32 = arith.constant 0 : i32
    %c0_i32_0 = arith.constant 0 : i32
    return %c0_i32, %arg0 : i32, i32
  }
  func.func @transform_1(%arg0: i32) -> (i32, i32) {
    %c0_i32 = arith.constant 0 : i32
    %c0_i32_0 = arith.constant 0 : i32
    return %c0_i32, %arg0 : i32, i32
  }
  func.func @transform_2(%arg0: i32) -> (i32, i32) {
    %c0_i32 = arith.constant 0 : i32
    %c0_i32_0 = arith.constant 0 : i32
    %c0_i32_1 = arith.constant 0 : i32
    return %c0_i32, %c0_i32_0 : i32, i32
  }
  func.func @transform_3(%arg0: i32) -> (i32, i32) {
    %c0_i32 = arith.constant 0 : i32
    %c0_i32_0 = arith.constant 0 : i32
    %c0_i32_1 = arith.constant 0 : i32
    return %c0_i32, %c0_i32_0 : i32, i32
  }
  func.func @transform_4(%arg0: i32) -> (i32, i32) {
    %c0_i32 = arith.constant 0 : i32
    %c0_i32_0 = arith.constant 0 : i32
    %c0_i32_1 = arith.constant 0 : i32
    return %c0_i32, %c0_i32_0 : i32, i32
  }
  func.func @transform_5(%arg0: i32) -> (i32, i32) {
    %c0_i32 = arith.constant 0 : i32
    %c0_i32_0 = arith.constant 0 : i32
    %c0_i32_1 = arith.constant 0 : i32
    return %c0_i32, %c0_i32_0 : i32, i32
  }
  func.func @transform_6(%arg0: i32) -> (i32, i32) {
    %c0_i32 = arith.constant 0 : i32
    %c0_i32_0 = arith.constant 0 : i32
    %c0_i32_1 = arith.constant 0 : i32
    return %c0_i32, %c0_i32_0 : i32, i32
  }
  func.func @transform_7(%arg0: i32) -> (i32, i32) {
    %c0_i32 = arith.constant 0 : i32
    %c0_i32_0 = arith.constant 0 : i32
    %c0_i32_1 = arith.constant 0 : i32
    return %c0_i32, %c0_i32_0 : i32, i32
  }
  func.func @transform_8(%arg0: i32) -> (i32, i32) {
    %c0_i32 = arith.constant 0 : i32
    %c0_i32_0 = arith.constant 0 : i32
    return %c0_i32, %arg0 : i32, i32
  }
  func.func @transform_9(%arg0: i32) -> (i32, i32) {
    %c0_i32 = arith.constant 0 : i32
    %c0_i32_0 = arith.constant 0 : i32
    return %c0_i32, %arg0 : i32, i32
  }
}

</mosaic_0001>

<bundles_post_ra>
// kernel: tpu_custom_call.1
= control target key start
LH: loop header
LB: loop body
LE: loop exit
PB: predicated region body
PF: predicated region fallthrough
CT: control target
= control target key end

     0   :  { %15 = vsyncpa [#allocation3], 0  ;;  %v1063_v7 = vmov 0   ;;  %vm181_vm0 = vcmask 261120   ;;  %s1839_s0 = inlined_call_operand.vmem [shape: f32[32,384], index: 0, kind: input, shape index: {}]   ;;  %s1840_s1 = inlined_call_operand.vmem [shape: f32[32,384], index: 1, kind: input, shape index: {}]   ;;  %s1841_s2 = inlined_call_operand.vmem [shape: f32[128,32], index: 2, kind: input, shape index: {}]   ;;  %s1842_s3 = inlined_call_operand.vmem [shape: f32[128,1], index: 3, kind: input, shape index: {}]   ;;  %s1843_s4 = inlined_call_operand.vmem [shape: f32[128,128], index: 4, kind: input, shape index: {}]   ;;  %s1844_s5 = inlined_call_operand.vmem [shape: f32[128,1], index: 5, kind: input, shape index: {}]   ;;  %s1845_s6 = inlined_call_operand.vmem [shape: f32[2,128], index: 6, kind: input, shape index: {}]   ;;  %s1846_s7 = inlined_call_operand.vmem [shape: f32[2,1], index: 7, kind: input, shape index: {}]   ;;  %s1847_s8 = inlined_call_operand.hbm [shape: f32[1,384], index: 8, kind: output, shape index: {0}]   ;;  %s1848_s9 = inlined_call_operand.hbm [shape: f32[1,384], index: 9, kind: output, shape index: {1}]  }
   0x1   :  { %v42_v0 = vld [vmem:[%s1839_s0 + $0x48] sm:$0xff]  ;;  %v43_v2 = vld [vmem:[%s1839_s0 + $0x50] sm:$0xff]  ;;  %1008 = vset.pattern.permute.xlu0 %v1063_v7  ;;  %1009 = vset.pattern.permute.xlu1 %v1063_v7  ;;  %v40_v10 = vld [vmem:[%s1839_s0 + $0x38] sm:$0xff] }
   0x2   :  { %v54_v1 = vld [vmem:[%s1840_s1 + $0x48] sm:$0xff]  ;;  %v55_v4 = vld [vmem:[%s1840_s1 + $0x50] sm:$0xff]  ;;  %v52_v11 = vld [vmem:[%s1840_s1 + $0x38] sm:$0xff]  ;;  %1010 = vset.pattern.permute.xlu2 %v1063_v7 }
   0x3   :  { %v66_v3 = vmul.f32 %v54_v1, %v42_v0  ;;  %v39_v5 = vld [vmem:[%s1839_s0 + $0x30] sm:$0xff]  ;;  %v67_v8 = vmul.f32 %v55_v4, %v43_v2  ;;  %v36_v12 = vld [vmem:[%s1839_s0 + $0x18] sm:$0xff]  ;;  %v64_v13 = vmul.f32 %v52_v11, %v40_v10  ;;  %v37_v15 = vld [vmem:[%s1839_s0 + $0x20] sm:$0xff] }
   0x4   :  { %v51_v6 = vld [vmem:[%s1840_s1 + $0x30] sm:$0xff]  ;;  %v48_v14 = vld [vmem:[%s1840_s1 + $0x18] sm:$0xff]  ;;  %v49_v16 = vld [vmem:[%s1840_s1 + $0x20] sm:$0xff] }
   0x5   :  { %v63_v9 = vmul.f32 %v51_v6, %v39_v5  ;;  %242 = vmatpush.msra.mxu0 %v66_v3  ;;  %997 = vmatpush.msra.mxu3 %v66_v3  ;;  %v60_v17 = vmul.f32 %v48_v14, %v36_v12  ;;  %v61_v18 = vmul.f32 %v49_v16, %v37_v15  ;;  %v33_v19 = vld [vmem:[%s1839_s0] sm:$0xff]  ;;  %v34_v21 = vld [vmem:[%s1839_s0 + $0x8] sm:$0xff]  ;;  %v1172_v26 = vld [vmem:[%s1841_s2 + $0x50] sm:$0xff] }
   0x6   :  { %307 = vmatpush.msra.mxu1 %v67_v8  ;;  %1001 = vmatpush.msra.mxu2 %v67_v8  ;;  %v45_v20 = vld [vmem:[%s1840_s1] sm:$0xff]  ;;  %v46_v23 = vld [vmem:[%s1840_s1 + $0x8] sm:$0xff] }
   0x7   :  { %243 = vmatpush.msra.mxu0 %v63_v9  ;;  %v57_v22 = vmul.f32 %v45_v20, %v33_v19  ;;  %998 = vmatpush.msra.mxu3 %v63_v9  ;;  %v58_v24 = vmul.f32 %v46_v23, %v34_v21  ;;  %v1167_v25 = vld [vmem:[%s1841_s2] sm:$0xff] }
   0x8   :  { %308 = vmatpush.msra.mxu1 %v64_v13  ;;  %1002 = vmatpush.msra.mxu2 %v64_v13 }
   0x9   :  { %244 = vmatpush.msra.mxu0 %v60_v17  ;;  %999 = vmatpush.msra.mxu3 %v60_v17 }
   0xa   :  { %309 = vmatpush.msra.mxu1 %v61_v18  ;;  %1003 = vmatpush.msra.mxu2 %v61_v18 }
   0xb   :  { %245 = vmatpush.msra.mxu0 %v57_v22  ;;  %1000 = vmatpush.msra.mxu3 %v57_v22 }
   0xc   :  { %16 = vsyncpa [#allocation5], 0  ;;  %310 = vmatpush.msra.mxu1 %v58_v24  ;;  %1004 = vmatpush.msra.mxu2 %v58_v24  ;;  %v100_v27 = vld [vmem:[%s1842_s3 + $0x78] sm:$0xff]  ;;  %v98_v28 = vld [vmem:[%s1842_s3 + $0x68] sm:$0xff]  ;;  %vm900_vm1 = vcmask 1040384   ;;  %s924_s25 = sshll.u32 %s1847_s8, 4  ;;  %s925_s25 = int_to_ptr.hbm [resolvable:$true] %s924_s25 }
   0xd   :  { %949 = vmatmul.msk.f32.vlgmr.msra.gmra.mxu0 %vm181_vm0, %v1167_v25  ;;  %965 = vmatmul.msk.f32.vlgmr.msra.gmra.mxu1 %vm181_vm0, %v1167_v25  ;;  %v96_v29 = vld [vmem:[%s1842_s3 + $0x58] sm:$0xff]  ;;  %v1194_v30 = vld [vmem:[%s1841_s2 + $0x8] sm:$0xff]  ;;  %v99_v32 = vld [vmem:[%s1842_s3 + $0x70] sm:$0xff]  ;;  %vm902_vm2 = vcmask 1041408   ;;  %s1065_s26 = smov [#allocation4]   ;;  %s935_s30 = sshll.u32 %s1848_s9, 4  ;;  %s936_s30 = int_to_ptr.hbm [resolvable:$true] %s935_s30 }
   0xe   :  { %975 = vmatmul.msk.f32.vlgmr.msra.gmra.mxu2 %vm181_vm0, %v1172_v26  ;;  %959 = vmatmul.msk.f32.vlgmr.msra.gmra.mxu3 %vm181_vm0, %v1172_v26  ;;  %v1199_v31 = vld [vmem:[%s1841_s2 + $0x58] sm:$0xff]  ;;  %v97_v33 = vld [vmem:[%s1842_s3 + $0x60] sm:$0xff]  ;;  %v95_v37 = vld [vmem:[%s1842_s3 + $0x50] sm:$0xff]  ;;  %s933_s27 = sshll.u32 %s1065_s26, 4  ;;  %s934_s27 = int_to_ptr.vmem [resolvable:$true] %s933_s27 }
   0xf   :  { %178 = vperm.xlu0 %1008, %v100_v27   ;;  %168 = vperm.xlu1 %1009, %v98_v28   ;;  %v44_v34 = vld [vmem:[%s1839_s0 + $0x58] sm:$0xff]  ;;  %v41_v38 = vld [vmem:[%s1839_s0 + $0x40] sm:$0xff]  ;;  %v38_v41 = vld [vmem:[%s1839_s0 + $0x28] sm:$0xff] }
  0x10   :  { %158 = vperm.xlu2 %1010, %v96_v29   ;;  %v56_v35 = vld [vmem:[%s1840_s1 + $0x58] sm:$0xff]  ;;  %v53_v39 = vld [vmem:[%s1840_s1 + $0x40] sm:$0xff]  ;;  %v50_v42 = vld [vmem:[%s1840_s1 + $0x28] sm:$0xff] }
  0x11   :  { %v68_v36 = vmul.f32 %v56_v35, %v44_v34  ;;  %v65_v40 = vmul.f32 %v53_v39, %v41_v38  ;;  %v62_v43 = vmul.f32 %v50_v42, %v38_v41  ;;  %v35_v44 = vld [vmem:[%s1839_s0 + $0x10] sm:$0xff]  ;;  %v1250_v47 = vld [vmem:[%s1841_s2 + $0x60] sm:$0xff]  ;;  %v94_v49 = vld [vmem:[%s1842_s3 + $0x48] sm:$0xff] }
  0x12   :  { %v47_v45 = vld [vmem:[%s1840_s1 + $0x10] sm:$0xff]  ;;  %v93_v50 = vld [vmem:[%s1842_s3 + $0x40] sm:$0xff]  ;;  %v1269_v51 = vld [vmem:[%s1841_s2 + $0x18] sm:$0xff] }
  0x13   :  { %372 = vmatpush.msrb.mxu2 %v68_v36  ;;  %v1245_v46 = vld [vmem:[%s1841_s2 + $0x10] sm:$0xff]  ;;  %v59_v48 = vmul.f32 %v47_v45, %v35_v44  ;;  %v1274_v52 = vld [vmem:[%s1841_s2 + $0x68] sm:$0xff]  ;;  %v73_v55 = vld [vmem:[%s1841_s2 + $0x20] sm:$0xff] }
  0x14   :  { %v91_v53 = vld [vmem:[%s1842_s3 + $0x30] sm:$0xff]  ;;  %v90_v54 = vld [vmem:[%s1842_s3 + $0x28] sm:$0xff]  ;;  %v88_v57 = vld [vmem:[%s1842_s3 + $0x18] sm:$0xff] }
  0x15   :  { %950 = vmatmul.msk.f32.gmra.mxu0 %vm181_vm0, %v1194_v30  ;;  %966 = vmatmul.msk.f32.gmra.mxu1 %vm181_vm0, %v1194_v30  ;;  %v1296_v56 = vld [vmem:[%s1841_s2 + $0x70] sm:$0xff]  ;;  %v74_v59 = vld [vmem:[%s1841_s2 + $0x28] sm:$0xff]  ;;  %v1316_v60 = vld [vmem:[%s1841_s2 + $0x78] sm:$0xff] }
  0x16   :  { %976 = vmatmul.msk.f32.gmra.mxu2 %vm181_vm0, %v1199_v31  ;;  %960 = vmatmul.msk.f32.gmra.mxu3 %vm181_vm0, %v1199_v31  ;;  %v87_v58 = vld [vmem:[%s1842_s3 + $0x10] sm:$0xff]  ;;  %v85_v61 = vld [vmem:[%s1842_s3] sm:$0xff]  ;;  %v504_v62 = vld [vmem:[%s1844_s5 + $0x78] sm:$0xff] }
  0x17   :  { %173 = vperm.xlu0 %1008, %v99_v32   ;;  %163 = vperm.xlu1 %1009, %v97_v33   ;;  %v92_v63 = vld [vmem:[%s1842_s3 + $0x38] sm:$0xff]  ;;  %v75_v0 = vld [vmem:[%s1841_s2 + $0x30] sm:$0xff]  ;;  %v502_v1 = vld [vmem:[%s1844_s5 + $0x68] sm:$0xff] }
  0x18   :  { %153 = vperm.xlu2 %1010, %v95_v37   ;;  %373 = vmatpush.msrb.mxu2 %v65_v40  ;;  %v501_v2 = vld [vmem:[%s1844_s5 + $0x60] sm:$0xff]  ;;  %v76_v4 = vld [vmem:[%s1841_s2 + $0x38] sm:$0xff]  ;;  %v499_v5 = vld [vmem:[%s1844_s5 + $0x50] sm:$0xff] }
  0x19   :  { %v89_v3 = vld [vmem:[%s1842_s3 + $0x20] sm:$0xff]  ;;  %v498_v6 = vld [vmem:[%s1844_s5 + $0x48] sm:$0xff]  ;;  %v496_v9 = vld [vmem:[%s1844_s5 + $0x38] sm:$0xff] }
  0x1a   :  { %374 = vmatpush.msrb.mxu2 %v62_v43  ;;  %v86_v7 = vld [vmem:[%s1842_s3 + $0x8] sm:$0xff]  ;;  %v77_v8 = vld [vmem:[%s1841_s2 + $0x40] sm:$0xff]  ;;  %v495_v10 = vld [vmem:[%s1844_s5 + $0x30] sm:$0xff] }
  0x1b   :  { %v503_v11 = vld [vmem:[%s1844_s5 + $0x70] sm:$0xff]  ;;  %v78_v12 = vld [vmem:[%s1841_s2 + $0x48] sm:$0xff]  ;;  %v493_v13 = vld [vmem:[%s1844_s5 + $0x20] sm:$0xff] }
  0x1c   :  { %375 = vmatpush.msrb.mxu2 %v59_v48  ;;  %v492_v14 = vld [vmem:[%s1844_s5 + $0x18] sm:$0xff]  ;;  %v490_v16 = vld [vmem:[%s1844_s5 + $0x8] sm:$0xff]  ;;  %v489_v17 = vld [vmem:[%s1844_s5] sm:$0xff] }
  0x1d   :  { %951 = vmatmul.msk.f32.gmra.mxu0 %vm181_vm0, %v1245_v46  ;;  %967 = vmatmul.msk.f32.gmra.mxu1 %vm181_vm0, %v1245_v46  ;;  %v500_v15 = vld [vmem:[%s1844_s5 + $0x58] sm:$0xff]  ;;  %v497_v18 = vld [vmem:[%s1844_s5 + $0x40] sm:$0xff]  ;;  %v494_v19 = vld [vmem:[%s1844_s5 + $0x28] sm:$0xff] }
  0x1e   :  { %977 = vmatmul.msk.f32.gmra.mxu2 %vm181_vm0, %v1250_v47  ;;  %961 = vmatmul.msk.f32.gmra.mxu3 %vm181_vm0, %v1250_v47  ;;  %v491_v20 = vld [vmem:[%s1844_s5 + $0x10] sm:$0xff]  ;;  %v829_v21 = vld [vmem:[%s1846_s7] sm:$0x3] }
  0x1f   :  { %148 = vperm.xlu0 %1008, %v94_v49   ;;  %143 = vperm.xlu1 %1009, %v93_v50  }
  0x20   :  { %138 = vperm.xlu2 %1010, %v92_v63  }
  0x25   :  { %952 = vmatmul.msk.f32.gmra.mxu0 %vm181_vm0, %v1269_v51  ;;  %968 = vmatmul.msk.f32.gmra.mxu1 %vm181_vm0, %v1269_v51 }
  0x26   :  { %978 = vmatmul.msk.f32.gmra.mxu2 %vm181_vm0, %v1274_v52  ;;  %962 = vmatmul.msk.f32.gmra.mxu3 %vm181_vm0, %v1274_v52 }
  0x27   :  { %133 = vperm.xlu0 %1008, %v91_v53   ;;  %128 = vperm.xlu1 %1009, %v90_v54  }
  0x28   :  { %123 = vperm.xlu2 %1010, %v89_v3  }
  0x2d   :  { %953 = vmatmul.msk.f32.gmra.mxu0 %vm181_vm0, %v73_v55  ;;  %969 = vmatmul.msk.f32.gmra.mxu1 %vm181_vm0, %v73_v55 }
  0x2e   :  { %979 = vmatmul.msk.f32.gmra.mxu2 %vm181_vm0, %v1296_v56  ;;  %963 = vmatmul.msk.f32.gmra.mxu3 %vm181_vm0, %v1296_v56 }
  0x2f   :  { %118 = vperm.xlu0 %1008, %v88_v57   ;;  %113 = vperm.xlu1 %1009, %v87_v58  }
  0x30   :  { %108 = vperm.xlu2 %1010, %v86_v7  }
  0x35   :  { %954 = vmatmul.msk.f32.gmra.mxu0 %vm181_vm0, %v74_v59  ;;  %970 = vmatmul.msk.f32.gmra.mxu1 %vm181_vm0, %v74_v59 }
  0x36   :  { %980 = vmatmul.msk.f32.gmra.mxu2 %vm181_vm0, %v1316_v60  ;;  %964 = vmatmul.msk.f32.gmra.mxu3 %vm181_vm0, %v1316_v60 }
  0x37   :  { %103 = vperm.xlu0 %1008, %v85_v61   ;;  %582 = vperm.xlu1 %1009, %v504_v62  }
  0x38   :  { %577 = vperm.xlu2 %1010, %v503_v11  }
  0x3d   :  { %955 = vmatmul.msk.f32.gmra.mxu0 %vm181_vm0, %v75_v0  ;;  %971 = vmatmul.msk.f32.gmra.mxu1 %vm181_vm0, %v75_v0 }
  0x3e   :  { %981 = vmatmul.msk.f32.vlgmr.msrb.gmra.mxu2 %vm181_vm0, %v1167_v25 }
  0x3f   :  { %572 = vperm.xlu0 %1008, %v502_v1   ;;  %567 = vperm.xlu1 %1009, %v501_v2  }
  0x40   :  { %562 = vperm.xlu2 %1010, %v500_v15  }
  0x45   :  { %956 = vmatmul.msk.f32.gmra.mxu0 %vm181_vm0, %v76_v4  ;;  %972 = vmatmul.msk.f32.gmra.mxu1 %vm181_vm0, %v76_v4 }
  0x46   :  { %982 = vmatmul.msk.f32.gmra.mxu2 %vm181_vm0, %v1194_v30 }
  0x47   :  { %557 = vperm.xlu0 %1008, %v499_v5   ;;  %552 = vperm.xlu1 %1009, %v498_v6  }
  0x48   :  { %547 = vperm.xlu2 %1010, %v497_v18  }
  0x4d   :  { %957 = vmatmul.msk.f32.gmra.mxu0 %vm181_vm0, %v77_v8  ;;  %973 = vmatmul.msk.f32.gmra.mxu1 %vm181_vm0, %v77_v8 }
  0x4e   :  { %983 = vmatmul.msk.f32.gmra.mxu2 %vm181_vm0, %v1245_v46 }
  0x4f   :  { %542 = vperm.xlu0 %1008, %v496_v9   ;;  %537 = vperm.xlu1 %1009, %v495_v10  }
  0x50   :  { %532 = vperm.xlu2 %1010, %v494_v19  }
  0x55   :  { %958 = vmatmul.msk.f32.gmra.mxu0 %vm181_vm0, %v78_v12  ;;  %974 = vmatmul.msk.f32.gmra.mxu1 %vm181_vm0, %v78_v12 }
  0x56   :  { %984 = vmatmul.msk.f32.gmra.mxu2 %vm181_vm0, %v1269_v51 }
  0x57   :  { %527 = vperm.xlu0 %1008, %v493_v13   ;;  %522 = vperm.xlu1 %1009, %v492_v14  }
  0x58   :  { %517 = vperm.xlu2 %1010, %v491_v20  }
  0x5e   :  { %985 = vmatmul.msk.f32.gmra.mxu2 %vm181_vm0, %v73_v55 }
  0x5f   :  { %512 = vperm.xlu0 %1008, %v490_v16   ;;  %507 = vperm.xlu1 %1009, %v489_v17  }
  0x60   :  { %832 = vperm.xlu2 %1010, %v829_v21  }
  0x66   :  { %986 = vmatmul.msk.f32.gmra.mxu2 %vm181_vm0, %v74_v59 }
  0x6e   :  { %987 = vmatmul.msk.f32.gmra.mxu2 %vm181_vm0, %v75_v0 }
  0x76   :  { %988 = vmatmul.msk.f32.gmra.mxu2 %vm181_vm0, %v76_v4 }
  0x7e   :  { %989 = vmatmul.msk.f32.gmra.mxu2 %vm181_vm0, %v77_v8 }
  0x81   :  { %v1425_v24 = vpop.permute.xlu0 %178  ;;  %v1455_v40 = vpop.permute.xlu1 %168 }
  0x86   :  { %990 = vmatmul.msk.f32.gmra.mxu2 %vm181_vm0, %v78_v12 }
  0x89   :  { %v1437_v30 = vpop.permute.xlu0 %173  ;;  %v1471_v51 = vpop.permute.xlu1 %163 }
  0x8a   :  { %v1421_v22 = vpop.f32.mrf.mxu0  ;;  %v1423_v23 = vpop.f32.mrf.mxu1 }
  0x8e   :  { %991 = vmatmul.msk.f32.gmra.mxu2 %vm181_vm0, %v1172_v26  ;;  %v1445_v26 = vpop.permute.xlu2 %158 }
  0x91   :  { %v1429_v25 = vpop.f32.mrf.mxu2  ;;  %v277_v27 = vpop.f32.mrf.mxu3 }
  0x92   :  { %v1431_v28 = vpop.f32.mrf.mxu0  ;;  %v1433_v29 = vpop.f32.mrf.mxu1 }
  0x93   :  { %v1447_v36 = vpop.permute.xlu0 %148  ;;  %v1485_v1 = vpop.permute.xlu1 %143 }
  0x96   :  { %992 = vmatmul.msk.f32.gmra.mxu2 %vm181_vm0, %v1199_v31  ;;  %v1461_v45 = vpop.permute.xlu2 %153 }
  0x97   :  { %v278_v12 = vadd.f32 %v277_v27, %v1461_v45  ;;  %v343_v16 = vadd.f32 %v1429_v25, %v1461_v45 }
  0x99   :  { %v345_v32 = vpop.f32.mrf.mxu2  ;;  %v280_v33 = vpop.f32.mrf.mxu3 }
  0x9a   :  { %v1439_v34 = vpop.f32.mrf.mxu0  ;;  %v1441_v35 = vpop.f32.mrf.mxu1  ;;  %v281_v7 = vadd.f32 %v280_v33, %v1445_v26  ;;  %v346_v11 = vadd.f32 %v345_v32, %v1445_v26  ;;  %v455_v33 = vmax.f32 %v278_v12, 0.0 }
  0x9b   :  { %v1463_v46 = vpop.permute.xlu0 %133  ;;  %v1501_v27 = vpop.permute.xlu1 %128 }
  0x9c   :  { %v458_v18 = vmax.f32 %v281_v7, 0.0  ;;  %v459_v32 = vmax.f32 %v346_v11, 0.0 }
  0x9e   :  { %993 = vmatmul.msk.f32.gmra.mxu2 %vm181_vm0, %v1250_v47 }
  0xa1   :  { %v348_v37 = vpop.f32.mrf.mxu2  ;;  %v283_v38 = vpop.f32.mrf.mxu3 }
  0xa2   :  { %v1449_v39 = vpop.f32.mrf.mxu0  ;;  %v1451_v31 = vpop.f32.mrf.mxu1  ;;  %v284_v0 = vadd.f32 %v283_v38, %v1471_v51  ;;  %v349_v6 = vadd.f32 %v348_v37, %v1471_v51  ;;  %v456_v37 = vmax.f32 %v343_v16, 0.0 }
  0xa3   :  { %v1475_v53 = vpop.permute.xlu0 %118 }
  0xa4   :  { %v461_v14 = vmax.f32 %v284_v0, 0.0  ;;  %v462_v17 = vmax.f32 %v349_v6, 0.0 }
  0xa6   :  { %994 = vmatmul.msk.f32.gmra.mxu2 %vm181_vm0, %v1274_v52  ;;  %v1473_v52 = vpop.permute.xlu2 %138 }
  0xa9   :  { %v351_v41 = vpop.f32.mrf.mxu2  ;;  %v286_v42 = vpop.f32.mrf.mxu3 }
  0xaa   :  { %v1457_v43 = vpop.f32.mrf.mxu0  ;;  %v1459_v44 = vpop.f32.mrf.mxu1  ;;  %v287_v58 = vadd.f32 %v286_v42, %v1455_v40 }
  0xab   :  { %v1492_v10 = vpop.permute.xlu0 %103 }
  0xac   :  { %v464_v9 = vmax.f32 %v287_v58, 0.0 }
  0xae   :  { %995 = vmatmul.msk.f32.gmra.mxu2 %vm181_vm0, %v1296_v56  ;;  %v1488_v5 = vpop.permute.xlu2 %123 }
  0xb1   :  { %v354_v47 = vpop.f32.mrf.mxu2  ;;  %v289_v48 = vpop.f32.mrf.mxu3 }
  0xb2   :  { %v1467_v49 = vpop.f32.mrf.mxu0  ;;  %v1469_v50 = vpop.f32.mrf.mxu1  ;;  %v290_v54 = vadd.f32 %v289_v48, %v1437_v30  ;;  %v355_v56 = vadd.f32 %v354_v47, %v1437_v30 }
  0xb3   :  { %v114_v48 = vpop.permute.xlu1 %113 }
  0xb4   :  { %v467_v3 = vmax.f32 %v290_v54, 0.0  ;;  %v468_v8 = vmax.f32 %v355_v56, 0.0 }
  0xb6   :  { %996 = vmatmul.msk.f32.gmra.mxu2 %vm181_vm0, %v1316_v60  ;;  %v352_v60 = vadd.f32 %v351_v41, %v1455_v40  ;;  %v109_v38 = vpop.permute.xlu2 %108 }
  0xb8   :  { %v465_v13 = vmax.f32 %v352_v60, 0.0 }
  0xb9   :  { %v357_v55 = vpop.f32.mrf.mxu2  ;;  %v292_v57 = vpop.f32.mrf.mxu3 }
  0xba   :  { %v358_v59 = vadd.f32 %v357_v55, %v1425_v24  ;;  %v265_v61 = vpop.f32.mrf.mxu0  ;;  %v330_v62 = vpop.f32.mrf.mxu1  ;;  %v293_v63 = vadd.f32 %v292_v57, %v1425_v24 }
  0xbc   :  { %v471_v2 = vmax.f32 %v358_v59, 0.0  ;;  %v470_v4 = vmax.f32 %v293_v63, 0.0 }
  0xbe   :  { %650 = vmatpush.msrb.mxu0 %v471_v2  ;;  %585 = vmatpush.msrb.mxu3 %v470_v4  ;;  %v331_v4 = vadd.f32 %v330_v62, %v1463_v46  ;;  %v325_v62 = vadd.f32 %v1459_v44, %v1488_v5  ;;  %v319_v44 = vadd.f32 %v1441_v35, %v114_v48 }
  0xc0   :  { %651 = vmatpush.msrb.mxu0 %v468_v8  ;;  %586 = vmatpush.msrb.mxu3 %v467_v3  ;;  %v266_v3 = vadd.f32 %v265_v61, %v1463_v46  ;;  %v444_v16 = vmax.f32 %v331_v4, 0.0  ;;  %v260_v61 = vadd.f32 %v1457_v43, %v1488_v5  ;;  %v438_v43 = vmax.f32 %v325_v62, 0.0 }
  0xc1   :  { %v377_v15 = vpop.f32.mrf.mxu2 }
  0xc2   :  { %v1499_v19 = vadd.f32 %v377_v15, %v1492_v10  ;;  %652 = vmatpush.msrb.mxu0 %v465_v13  ;;  %v268_v20 = vpop.f32.mrf.mxu0  ;;  %v333_v21 = vpop.f32.mrf.mxu1  ;;  %587 = vmatpush.msrb.mxu3 %v464_v9  ;;  %v263_v13 = vadd.f32 %v1467_v49, %v1501_v27  ;;  %v443_v15 = vmax.f32 %v266_v3, 0.0  ;;  %v1590_v3 = vld [vmem:[%s1843_s4 + $0x30] sm:$0xff] }
  0xc3   :  { %v269_v63 = vadd.f32 %v268_v20, %v1473_v52  ;;  %v334_v0 = vadd.f32 %v333_v21, %v1473_v52  ;;  %v322_v21 = vadd.f32 %v1451_v31, %v1475_v53  ;;  %v251_v31 = vadd.f32 %v1431_v28, %v109_v38 }
  0xc4   :  { %653 = vmatpush.msrb.mxu0 %v462_v17  ;;  %588 = vmatpush.msrb.mxu3 %v461_v14  ;;  %v328_v14 = vadd.f32 %v1469_v50, %v1501_v27  ;;  %v440_v49 = vmax.f32 %v263_v13, 0.0  ;;  %v257_v50 = vadd.f32 %v1449_v39, %v1475_v53  ;;  %v1618_v13 = vld [vmem:[%s1843_s4 + $0x50] sm:$0xff] }
  0xc5   :  { %v446_v11 = vmax.f32 %v269_v63, 0.0  ;;  %v447_v12 = vmax.f32 %v334_v0, 0.0  ;;  %v1576_v63 = vld [vmem:[%s1843_s4 + $0x20] sm:$0xff] }
  0xc6   :  { %654 = vmatpush.msrb.mxu0 %v459_v32  ;;  %589 = vmatpush.msrb.mxu3 %v458_v18  ;;  %v441_v20 = vmax.f32 %v328_v14, 0.0  ;;  %v437_v32 = vmax.f32 %v260_v61, 0.0 }
  0xc8   :  { %655 = vmatpush.msrb.mxu0 %v456_v37  ;;  %590 = vmatpush.msrb.mxu3 %v455_v33  ;;  %v254_v33 = vadd.f32 %v1439_v34, %v114_v48  ;;  %v434_v37 = vmax.f32 %v257_v50, 0.0 }
  0xc9   :  { %v380_v25 = vpop.f32.mrf.mxu2 }
  0xca   :  { %v1503_v41 = vadd.f32 %v380_v25, %v109_v38  ;;  %v271_v42 = vpop.f32.mrf.mxu0  ;;  %v336_v47 = vpop.f32.mrf.mxu1  ;;  %v435_v25 = vmax.f32 %v322_v21, 0.0  ;;  %v431_v39 = vmax.f32 %v254_v33, 0.0 }
  0xcb   :  { %v272_v54 = vadd.f32 %v271_v42, %v1485_v1  ;;  %v337_v55 = vadd.f32 %v336_v47, %v1485_v1  ;;  %v316_v42 = vadd.f32 %v1433_v29, %v109_v38  ;;  %v428_v29 = vmax.f32 %v251_v31, 0.0 }
  0xcc   :  { %v427_v31 = vmax.f32 %v1499_v19, 0.0 }
  0xcd   :  { %v449_v6 = vmax.f32 %v272_v54, 0.0  ;;  %v450_v7 = vmax.f32 %v337_v55, 0.0  ;;  %v432_v54 = vmax.f32 %v319_v44, 0.0  ;;  %v429_v35 = vmax.f32 %v316_v42, 0.0 }
  0xd1   :  { %v383_v57 = vpop.f32.mrf.mxu2 }
  0xd2   :  { %v1507_v56 = vadd.f32 %v383_v57, %v114_v48  ;;  %v274_v58 = vpop.f32.mrf.mxu0  ;;  %v339_v59 = vpop.f32.mrf.mxu1  ;;  %v248_v48 = vadd.f32 %v1421_v22, %v1492_v10  ;;  %v1553_v22 = vld [vmem:[%s1843_s4 + $0x8] sm:$0xff] }
  0xd3   :  { %v275_v60 = vadd.f32 %v274_v58, %v1447_v36  ;;  %v340_v2 = vadd.f32 %v339_v59, %v1447_v36  ;;  %v1569_v58 = vld [vmem:[%s1843_s4 + $0x18] sm:$0xff] }
  0xd4   :  { %v425_v57 = vmax.f32 %v248_v48, 0.0 }
  0xd5   :  { %v452_v8 = vmax.f32 %v275_v60, 0.0  ;;  %v453_v9 = vmax.f32 %v340_v2, 0.0  ;;  %v1583_v60 = vld [vmem:[%s1843_s4 + $0x28] sm:$0xff] }
  0xd7   :  { %591 = vmatpush.msrb.mxu3 %v452_v8  ;;  %656 = vmatpush.msrb.mxu0 %v453_v9  ;;  %v1604_v8 = vld [vmem:[%s1843_s4 + $0x40] sm:$0xff] }
  0xd9   :  { %v386_v17 = vpop.f32.mrf.mxu2  ;;  %592 = vmatpush.msrb.mxu3 %v449_v6  ;;  %657 = vmatpush.msrb.mxu0 %v450_v7  ;;  %v1597_v6 = vld [vmem:[%s1843_s4 + $0x38] sm:$0xff] }
  0xda   :  { %v1524_v18 = vadd.f32 %v386_v17, %v1475_v53  ;;  %v313_v53 = vadd.f32 %v1423_v23, %v1492_v10  ;;  %v1544_v23 = vld [vmem:[%s1843_s4] sm:$0xff]  ;;  %v1562_v10 = vld [vmem:[%s1843_s4 + $0x10] sm:$0xff] }
  0xdb   :  { %593 = vmatpush.msrb.mxu3 %v446_v11  ;;  %658 = vmatpush.msrb.mxu0 %v447_v12  ;;  %v1611_v11 = vld [vmem:[%s1843_s4 + $0x48] sm:$0xff] }
  0xdc   :  { %v426_v55 = vmax.f32 %v313_v53, 0.0 }
  0xdd   :  { %594 = vmatpush.msrb.mxu3 %v443_v15  ;;  %659 = vmatpush.msrb.mxu0 %v444_v16 }
  0xdf   :  { %595 = vmatpush.msrb.mxu3 %v440_v49  ;;  %660 = vmatpush.msrb.mxu0 %v441_v20  ;;  %v1629_v20 = vld [vmem:[%s1843_s4 + $0x58] sm:$0xff] }
  0xe1   :  { %v389_v47 = vpop.f32.mrf.mxu2  ;;  %596 = vmatpush.msrb.mxu3 %v437_v32  ;;  %661 = vmatpush.msrb.mxu0 %v438_v43 }
  0xe2   :  { %v1537_v34 = vadd.f32 %v389_v47, %v1488_v5  ;;  %v436_v47 = vmax.f32 %v1524_v18, 0.0 }
  0xe3   :  { %597 = vmatpush.msrb.mxu3 %v434_v37  ;;  %662 = vmatpush.msrb.mxu0 %v435_v25 }
  0xe5   :  { %598 = vmatpush.msrb.mxu3 %v431_v39  ;;  %663 = vmatpush.msrb.mxu0 %v432_v54  ;;  %v487_v39 = vld [vmem:[%s1843_s4 + $0x70] sm:$0xff]  ;;  %v430_v54 = vmax.f32 %v1503_v41, 0.0 }
  0xe7   :  { %599 = vmatpush.msrb.mxu3 %v428_v29  ;;  %664 = vmatpush.msrb.mxu0 %v429_v35 }
  0xe9   :  { %v1546_v28 = vpop.f32.mrf.mxu2  ;;  %600 = vmatpush.msrb.mxu3 %v425_v57  ;;  %665 = vmatpush.msrb.mxu0 %v426_v55 }
  0xea   :  { %601 = vmatmul.f32.vlgmr.msrb.gmra.mxu3 %v1544_v23  ;;  %666 = vmatmul.f32.vlgmr.msrb.gmra.mxu0 %v1544_v23 }
  0xf1   :  { %v1555_v5 = vpop.f32.mrf.mxu2 }
  0xf2   :  { %604 = vmatmul.f32.gmra.mxu3 %v1553_v22  ;;  %669 = vmatmul.f32.gmra.mxu0 %v1553_v22  ;;  %v396_v44 = vadd.f32 %v1555_v5, %v1463_v46  ;;  %v439_v46 = vmax.f32 %v1537_v34, 0.0 }
  0xf4   :  { %v445_v25 = vmax.f32 %v396_v44, 0.0 }
  0xf9   :  { %v398_v38 = vpop.f32.mrf.mxu2 }
  0xfa   :  { %607 = vmatmul.f32.gmra.mxu3 %v1562_v10  ;;  %672 = vmatmul.f32.gmra.mxu0 %v1562_v10 }
 0x101   :  { %v401_v59 = vpop.f32.mrf.mxu2 }
 0x102   :  { %610 = vmatmul.f32.gmra.mxu3 %v1569_v58  ;;  %675 = vmatmul.f32.gmra.mxu0 %v1569_v58  ;;  %v402_v32 = vadd.f32 %v401_v59, %v1485_v1 }
 0x104   :  { %v451_v37 = vmax.f32 %v402_v32, 0.0 }
 0x109   :  { %v404_v0 = vpop.f32.mrf.mxu2 }
 0x10a   :  { %613 = vmatmul.f32.gmra.mxu3 %v1576_v63  ;;  %678 = vmatmul.f32.gmra.mxu0 %v1576_v63 }
 0x111   :  { %v407_v2 = vpop.f32.mrf.mxu2 }
 0x112   :  { %616 = vmatmul.f32.gmra.mxu3 %v1583_v60  ;;  %681 = vmatmul.f32.gmra.mxu0 %v1583_v60 }
 0x119   :  { %v410_v4 = vpop.f32.mrf.mxu2 }
 0x11a   :  { %619 = vmatmul.f32.gmra.mxu3 %v1590_v3  ;;  %684 = vmatmul.f32.gmra.mxu0 %v1590_v3 }
 0x121   :  { %v413_v7 = vpop.f32.mrf.mxu2 }
 0x122   :  { %622 = vmatmul.f32.gmra.mxu3 %v1597_v6  ;;  %687 = vmatmul.f32.gmra.mxu0 %v1597_v6  ;;  %v414_v62 = vadd.f32 %v413_v7, %v1471_v51  ;;  %v1712_v7 = vpop.permute.xlu1 %582 }
 0x124   :  { %v463_v21 = vmax.f32 %v414_v62, 0.0 }
 0x129   :  { %v416_v9 = vpop.f32.mrf.mxu2 }
 0x12a   :  { %625 = vmatmul.f32.gmra.mxu3 %v1604_v8  ;;  %690 = vmatmul.f32.gmra.mxu0 %v1604_v8  ;;  %v417_v17 = vadd.f32 %v416_v9, %v1455_v40  ;;  %v405_v40 = vadd.f32 %v404_v0, %v1447_v36  ;;  %v393_v36 = vadd.f32 %v1546_v28, %v1501_v27  ;;  %v433_v27 = vmax.f32 %v1507_v56, 0.0  ;;  %v488_v56 = vld [vmem:[%s1843_s4 + $0x78] sm:$0xff]  ;;  %v1714_v9 = vpop.permute.xlu2 %577 }
 0x12c   :  { %v466_v50 = vmax.f32 %v417_v17, 0.0  ;;  %v454_v33 = vmax.f32 %v405_v40, 0.0  ;;  %v442_v42 = vmax.f32 %v393_v36, 0.0 }
 0x131   :  { %v419_v12 = vpop.f32.mrf.mxu2 }
 0x132   :  { %628 = vmatmul.f32.gmra.mxu3 %v1611_v11  ;;  %693 = vmatmul.f32.gmra.mxu0 %v1611_v11  ;;  %v420_v15 = vadd.f32 %v419_v12, %v1437_v30  ;;  %v411_v30 = vadd.f32 %v410_v4, %v1445_v26  ;;  %v1640_v26 = vld [vmem:[%s1843_s4 + $0x60] sm:$0xff]  ;;  %v1716_v12 = vpop.permute.xlu0 %572 }
 0x134   :  { %v469_v49 = vmax.f32 %v420_v15, 0.0  ;;  %v460_v51 = vmax.f32 %v411_v30, 0.0 }
 0x139   :  { %v422_v14 = vpop.f32.mrf.mxu2 }
 0x13a   :  { %v423_v16 = vadd.f32 %v422_v14, %v1425_v24  ;;  %631 = vmatmul.f32.gmra.mxu3 %v1618_v13  ;;  %696 = vmatmul.f32.gmra.mxu0 %v1618_v13  ;;  %v408_v24 = vadd.f32 %v407_v2, %v1461_v45  ;;  %v399_v45 = vadd.f32 %v398_v38, %v1473_v52  ;;  %v486_v52 = vld [vmem:[%s1843_s4 + $0x68] sm:$0xff] }
 0x13c   :  { %v472_v61 = vmax.f32 %v423_v16, 0.0  ;;  %v457_v43 = vmax.f32 %v408_v24, 0.0  ;;  %v448_v1 = vmax.f32 %v399_v45, 0.0  ;;  %v1720_v16 = vpop.permute.xlu2 %562 }
 0x13e   :  { %715 = vmatpush.msrb.mxu1 %v472_v61  ;;  %v1724_v61 = vpop.permute.xlu0 %557 }
 0x140   :  { %716 = vmatpush.msrb.mxu1 %v469_v49 }
 0x142   :  { %717 = vmatpush.msrb.mxu1 %v466_v50  ;;  %634 = vmatmul.f32.gmra.mxu3 %v1629_v20 }
 0x143   :  { %699 = vmatmul.f32.gmra.mxu0 %v1629_v20 }
 0x144   :  { %718 = vmatpush.msrb.mxu1 %v463_v21 }
 0x146   :  { %719 = vmatpush.msrb.mxu1 %v460_v51  ;;  %v1733_v51 = vpop.permute.xlu2 %547  ;;  %v1736_v45 = vpop.permute.xlu0 %542 }
 0x148   :  { %720 = vmatpush.msrb.mxu1 %v457_v43 }
 0x14a   :  { %721 = vmatpush.msrb.mxu1 %v454_v33  ;;  %637 = vmatmul.f32.gmra.mxu3 %v1640_v26 }
 0x14b   :  { %702 = vmatmul.f32.gmra.mxu0 %v1640_v26 }
 0x14c   :  { %722 = vmatpush.msrb.mxu1 %v451_v37 }
 0x14e   :  { %723 = vmatpush.msrb.mxu1 %v448_v1 }
 0x150   :  { %724 = vmatpush.msrb.mxu1 %v445_v25 }
 0x152   :  { %725 = vmatpush.msrb.mxu1 %v442_v42  ;;  %640 = vmatmul.f32.gmra.mxu3 %v486_v52 }
 0x153   :  { %705 = vmatmul.f32.gmra.mxu0 %v486_v52 }
 0x154   :  { %726 = vmatpush.msrb.mxu1 %v439_v46 }
 0x156   :  { %727 = vmatpush.msrb.mxu1 %v436_v47 }
 0x158   :  { %728 = vmatpush.msrb.mxu1 %v433_v27 }
 0x15a   :  { %729 = vmatpush.msrb.mxu1 %v430_v54  ;;  %643 = vmatmul.f32.gmra.mxu3 %v487_v39 }
 0x15b   :  { %708 = vmatmul.f32.gmra.mxu0 %v487_v39 }
 0x15c   :  { %730 = vmatpush.msrb.mxu1 %v427_v31 }
 0x15d   :  { %731 = vmatmul.f32.vlgmr.msrb.gmra.mxu1 %v1544_v23 }
 0x162   :  { %646 = vmatmul.f32.gmra.mxu3 %v488_v56 }
 0x163   :  { %711 = vmatmul.f32.gmra.mxu0 %v488_v56 }
 0x165   :  { %734 = vmatmul.f32.gmra.mxu1 %v1553_v22 }
 0x167   :  { %v1665_v18 = vpop.f32.mrf.mxu0 }
 0x16d   :  { %737 = vmatmul.f32.gmra.mxu1 %v1562_v10  ;;  %v1668_v41 = vpop.f32.mrf.mxu3 }
 0x16f   :  { %v1670_v19 = vpop.f32.mrf.mxu0 }
 0x175   :  { %740 = vmatmul.f32.gmra.mxu1 %v1569_v58  ;;  %v1673_v53 = vpop.f32.mrf.mxu3 }
 0x177   :  { %v1675_v34 = vpop.f32.mrf.mxu0 }
 0x17d   :  { %743 = vmatmul.f32.gmra.mxu1 %v1576_v63  ;;  %v1678_v35 = vpop.f32.mrf.mxu3 }
 0x17f   :  { %v1680_v48 = vpop.f32.mrf.mxu0 }
 0x185   :  { %746 = vmatmul.f32.gmra.mxu1 %v1583_v60  ;;  %v1683_v29 = vpop.f32.mrf.mxu3 }
 0x187   :  { %v1685_v55 = vpop.f32.mrf.mxu0 }
 0x18d   :  { %749 = vmatmul.f32.gmra.mxu1 %v1590_v3  ;;  %v1688_v57 = vpop.f32.mrf.mxu3 }
 0x18f   :  { %v1690_v23 = vpop.f32.mrf.mxu0 }
 0x195   :  { %752 = vmatmul.f32.gmra.mxu1 %v1597_v6  ;;  %v1693_v28 = vpop.f32.mrf.mxu3 }
 0x197   :  { %v1695_v22 = vpop.f32.mrf.mxu0 }
 0x19d   :  { %755 = vmatmul.f32.gmra.mxu1 %v1604_v8  ;;  %v1698_v5 = vpop.f32.mrf.mxu3 }
 0x19f   :  { %v1700_v10 = vpop.f32.mrf.mxu0 }
 0x1a5   :  { %758 = vmatmul.f32.gmra.mxu1 %v1611_v11  ;;  %v1703_v38 = vpop.f32.mrf.mxu3 }
 0x1a7   :  { %v691_v58 = vpop.f32.mrf.mxu0 }
 0x1ad   :  { %761 = vmatmul.f32.gmra.mxu1 %v1618_v13  ;;  %v1706_v59 = vpop.f32.mrf.mxu3  ;;  %v1718_v13 = vpop.permute.xlu1 %567 }
 0x1af   :  { %v694_v63 = vpop.f32.mrf.mxu0 }
 0x1b5   :  { %764 = vmatmul.f32.gmra.mxu1 %v1629_v20  ;;  %v1709_v0 = vpop.f32.mrf.mxu3  ;;  %v1726_v49 = vpop.permute.xlu1 %552 }
 0x1b6   :  { %v695_v54 = vadd.f32 %v694_v63, %v1726_v49 }
 0x1b7   :  { %v697_v60 = vpop.f32.mrf.mxu0 }
 0x1b8   :  { %v698_v42 = vadd.f32 %v697_v60, %v1724_v61  ;;  %v1751_v60 = vpop.permute.xlu2 %532  ;;  %v808_v63 = vmax.f32 %v695_v54, 0.0 }
 0x1bd   :  { %767 = vmatmul.f32.gmra.mxu1 %v1640_v26  ;;  %v632_v2 = vpop.f32.mrf.mxu3  ;;  %v1741_v1 = vpop.permute.xlu1 %537 }
 0x1c0   :  { %v700_v3 = vpop.f32.mrf.mxu0 }
 0x1c1   :  { %v701_v37 = vadd.f32 %v700_v3, %v1720_v16 }
 0x1c3   :  { %v814_v31 = vmax.f32 %v701_v37, 0.0  ;;  %v1778_v37 = vpop.permute.xlu2 %517 }
 0x1c5   :  { %770 = vmatmul.f32.gmra.mxu1 %v486_v52  ;;  %v635_v4 = vpop.f32.mrf.mxu3 }
 0x1c8   :  { %v703_v6 = vpop.f32.mrf.mxu0 }
 0x1c9   :  { %v704_v32 = vadd.f32 %v703_v6, %v1718_v13  ;;  %v692_v6 = vadd.f32 %v691_v58, %v1733_v51  ;;  %v686_v58 = vadd.f32 %v1695_v22, %v1741_v1 }
 0x1cb   :  { %v817_v46 = vmax.f32 %v704_v32, 0.0  ;;  %v624_v32 = vadd.f32 %v1703_v38, %v1736_v45  ;;  %v618_v38 = vadd.f32 %v1693_v28, %v1751_v60 }
 0x1cd   :  { %773 = vmatmul.f32.gmra.mxu1 %v487_v39  ;;  %v638_v8 = vpop.f32.mrf.mxu3 }
 0x1ce   :  { %v639_v47 = vadd.f32 %v638_v8, %v1718_v13  ;;  %v633_v8 = vadd.f32 %v632_v2, %v1724_v61  ;;  %v1762_v2 = vpop.permute.xlu1 %522 }
 0x1d0   :  { %v706_v11 = vpop.f32.mrf.mxu0 }
 0x1d1   :  { %v707_v21 = vadd.f32 %v706_v11, %v1716_v12  ;;  %v811_v11 = vmax.f32 %v698_v42, 0.0 }
 0x1d3   :  { %v820_v36 = vmax.f32 %v707_v21, 0.0 }
 0x1d5   :  { %776 = vmatmul.f32.gmra.mxu1 %v488_v56  ;;  %v641_v14 = vpop.f32.mrf.mxu3  ;;  %v636_v56 = vadd.f32 %v635_v4, %v1720_v16  ;;  %v630_v4 = vadd.f32 %v1709_v0, %v1726_v49 }
 0x1d6   :  { %v642_v25 = vadd.f32 %v641_v14, %v1716_v12  ;;  %v816_v14 = vmax.f32 %v639_v47, 0.0  ;;  %v1792_v47 = vpop.permute.xlu1 %507 }
 0x1d7   :  { %v807_v22 = vmax.f32 %v630_v4, 0.0  ;;  %v668_v54 = vadd.f32 %v1665_v18, %v1792_v47  ;;  %v1805_v18 = vld [vmem:[%s1845_s6] sm:$0x3]  ;;  %s1064_s6 = smov [#allocation2]  }
 0x1d8   :  { %v709_v15 = vpop.f32.mrf.mxu0  ;;  %v819_v3 = vmax.f32 %v642_v25, 0.0  ;;  %s922_s22 = sshll.u32 %s1064_s6, 4  ;;  %s923_s22 = int_to_ptr.vmem [resolvable:$true] %s922_s22 }
 0x1d9   :  { %v710_v30 = vadd.f32 %v709_v15, %v1714_v9  ;;  %v689_v15 = vadd.f32 %v1700_v10, %v1736_v45  ;;  %v810_v10 = vmax.f32 %v633_v8, 0.0 }
 0x1da   :  { %v1722_v17 = vpop.f32.mrf.mxu1 }
 0x1db   :  { %v823_v43 = vmax.f32 %v710_v30, 0.0  ;;  %v805_v30 = vmax.f32 %v692_v6, 0.0  ;;  %v802_v0 = vmax.f32 %v689_v15, 0.0 }
 0x1dd   :  { %v644_v62 = vpop.f32.mrf.mxu3 }
 0x1de   :  { %v645_v33 = vadd.f32 %v644_v62, %v1714_v9  ;;  %v1756_v62 = vpop.permute.xlu0 %527 }
 0x1e0   :  { %v712_v20 = vpop.f32.mrf.mxu0  ;;  %v822_v27 = vmax.f32 %v645_v33, 0.0 }
 0x1e1   :  { %v713_v50 = vadd.f32 %v712_v20, %v1712_v7  ;;  %v813_v20 = vmax.f32 %v636_v56, 0.0 }
 0x1e2   :  { %v1730_v24 = vpop.f32.mrf.mxu1 }
 0x1e3   :  { %v826_v40 = vmax.f32 %v713_v50, 0.0  ;;  %v627_v50 = vadd.f32 %v1706_v59, %v1733_v51  ;;  %v621_v59 = vadd.f32 %v1698_v5, %v1741_v1 }
 0x1e5   :  { %855 = vmatpush.msra.mxu3 %v826_v40  ;;  %v647_v26 = vpop.f32.mrf.mxu3  ;;  %v683_v40 = vadd.f32 %v1690_v23, %v1751_v60  ;;  %v804_v33 = vmax.f32 %v627_v50, 0.0  ;;  %v677_v23 = vadd.f32 %v1680_v48, %v1762_v2  ;;  %v798_v48 = vmax.f32 %v621_v59, 0.0 }
 0x1e6   :  { %v648_v44 = vadd.f32 %v647_v26, %v1712_v7  ;;  %v799_v26 = vmax.f32 %v686_v58, 0.0  ;;  %v1784_v5 = vpop.permute.xlu0 %512 }
 0x1e7   :  { %856 = vmatpush.msra.mxu3 %v823_v43  ;;  %v680_v43 = vadd.f32 %v1685_v55, %v1756_v62  ;;  %v674_v55 = vadd.f32 %v1675_v34, %v1778_v37  ;;  %v790_v28 = vmax.f32 %v677_v23, 0.0  ;;  %v612_v34 = vadd.f32 %v1683_v29, %v1762_v2 }
 0x1e8   :  { %v825_v52 = vmax.f32 %v648_v44, 0.0  ;;  %v796_v44 = vmax.f32 %v683_v40, 0.0  ;;  %v781_v29 = vmax.f32 %v668_v54, 0.0 }
 0x1e9   :  { %857 = vmatpush.msra.mxu3 %v820_v36  ;;  %v801_v36 = vmax.f32 %v624_v32, 0.0  ;;  %v793_v25 = vmax.f32 %v680_v43, 0.0  ;;  %v789_v6 = vmax.f32 %v612_v34, 0.0 }
 0x1ea   :  { %v1746_v39 = vpop.f32.mrf.mxu1  ;;  %835 = vmatpush.msra.mxu2 %v825_v52  ;;  %v615_v52 = vadd.f32 %v1688_v57, %v1756_v62  ;;  %v787_v57 = vmax.f32 %v674_v55, 0.0 }
 0x1eb   :  { %858 = vmatpush.msra.mxu3 %v817_v46  ;;  %v671_v46 = vadd.f32 %v1670_v19, %v1784_v5 }
 0x1ec   :  { %836 = vmatpush.msra.mxu2 %v822_v27  ;;  %v795_v27 = vmax.f32 %v618_v38, 0.0  ;;  %v792_v56 = vmax.f32 %v615_v52, 0.0 }
 0x1ed   :  { %859 = vmatpush.msra.mxu3 %v814_v31  ;;  %v609_v31 = vadd.f32 %v1678_v35, %v1778_v37  ;;  %v784_v19 = vmax.f32 %v671_v46, 0.0 }
 0x1ee   :  { %837 = vmatpush.msra.mxu2 %v819_v3  ;;  %v606_v3 = vadd.f32 %v1673_v53, %v1784_v5 }
 0x1ef   :  { %860 = vmatpush.msra.mxu3 %v811_v11  ;;  %v603_v11 = vadd.f32 %v1668_v41, %v1792_v47  ;;  %v786_v35 = vmax.f32 %v609_v31, 0.0 }
 0x1f0   :  { %838 = vmatpush.msra.mxu2 %v816_v14  ;;  %v783_v14 = vmax.f32 %v606_v3, 0.0 }
 0x1f1   :  { %861 = vmatpush.msra.mxu3 %v808_v63  ;;  %v780_v53 = vmax.f32 %v603_v11, 0.0 }
 0x1f2   :  { %v1766_v21 = vpop.f32.mrf.mxu1  ;;  %839 = vmatpush.msra.mxu2 %v813_v20 }
 0x1f3   :  { %862 = vmatpush.msra.mxu3 %v805_v30 }
 0x1f4   :  { %840 = vmatpush.msra.mxu2 %v810_v10 }
 0x1f5   :  { %863 = vmatpush.msra.mxu3 %v802_v0 }
 0x1f6   :  { %841 = vmatpush.msra.mxu2 %v807_v22 }
 0x1f7   :  { %864 = vmatpush.msra.mxu3 %v799_v26 }
 0x1f8   :  { %842 = vmatpush.msra.mxu2 %v804_v33 }
 0x1f9   :  { %865 = vmatpush.msra.mxu3 %v796_v44 }
 0x1fa   :  { %v1788_v42 = vpop.f32.mrf.mxu1  ;;  %843 = vmatpush.msra.mxu2 %v801_v36 }
 0x1fb   :  { %866 = vmatpush.msra.mxu3 %v793_v25 }
 0x1fc   :  { %844 = vmatpush.msra.mxu2 %v798_v48 }
 0x1fd   :  { %867 = vmatpush.msra.mxu3 %v790_v28 }
 0x1fe   :  { %845 = vmatpush.msra.mxu2 %v795_v27 }
 0x1ff   :  { %868 = vmatpush.msra.mxu3 %v787_v57 }
 0x200   :  { %846 = vmatpush.msra.mxu2 %v792_v56 }
 0x201   :  { %869 = vmatpush.msra.mxu3 %v784_v19 }
 0x202   :  { %v747_v8 = vpop.f32.mrf.mxu1  ;;  %847 = vmatpush.msra.mxu2 %v789_v6 }
 0x203   :  { %870 = vmatpush.msra.mxu3 %v781_v29 }
 0x204   :  { %871 = vmatmul.f32.vlgmr.msra.gmra.mxu3 %v1805_v18  ;;  %848 = vmatpush.msra.mxu2 %v786_v35 }
 0x206   :  { %849 = vmatpush.msra.mxu2 %v783_v14 }
 0x208   :  { %850 = vmatpush.msra.mxu2 %v780_v53 }
 0x209   :  { %851 = vmatmul.f32.vlgmr.msra.gmra.mxu2 %v1805_v18 }
 0x20a   :  { %v750_v15 = vpop.f32.mrf.mxu1 }
 0x212   :  { %v753_v63 = vpop.f32.mrf.mxu1 }
 0x21a   :  { %v756_v4 = vpop.f32.mrf.mxu1 }
 0x222   :  { %v759_v20 = vpop.f32.mrf.mxu1 }
 0x223   :  { %v760_v36 = vadd.f32 %v759_v20, %v1726_v49  ;;  %v745_v49 = vadd.f32 %v1788_v42, %v1756_v62  ;;  %v733_v62 = vadd.f32 %v1722_v17, %v1792_v47  ;;  %v905_v17 = vlaneseq }
 0x225   :  { %v809_v55 = vmax.f32 %v760_v36, 0.0  ;;  %vm907_vm3 = vcmp.lt.s32.totalorder %v905_v17, 384 }
 0x22a   :  { %v762_v58 = vpop.f32.mrf.mxu1 }
 0x22b   :  { %v763_v44 = vadd.f32 %v762_v58, %v1724_v61  ;;  %v748_v61 = vadd.f32 %v747_v8, %v1751_v60  ;;  %v736_v60 = vadd.f32 %v1730_v24, %v1784_v5 }
 0x22d   :  { %v797_v46 = vmax.f32 %v748_v61, 0.0  ;;  %v785_v34 = vmax.f32 %v736_v60, 0.0 }
 0x232   :  { %v765_v30 = vpop.f32.mrf.mxu1 }
 0x233   :  { %v766_v33 = vadd.f32 %v765_v30, %v1720_v16  ;;  %v751_v16 = vadd.f32 %v750_v15, %v1741_v1  ;;  %v794_v1 = vmax.f32 %v745_v49, 0.0 }
 0x235   :  { %v800_v48 = vmax.f32 %v751_v16, 0.0 }
 0x23a   :  { %v768_v41 = vpop.f32.mrf.mxu1 }
 0x23b   :  { %v769_v26 = vadd.f32 %v768_v41, %v1718_v13  ;;  %v754_v13 = vadd.f32 %v753_v63, %v1736_v45  ;;  %v739_v45 = vadd.f32 %v1746_v39, %v1778_v37  ;;  %v833_v39 = vpop.permute.xlu2 %832 }
 0x23d   :  { %v818_v38 = vmax.f32 %v769_v26, 0.0  ;;  %v803_v52 = vmax.f32 %v754_v13, 0.0  ;;  %v788_v42 = vmax.f32 %v739_v45, 0.0 }
 0x242   :  { %v771_v50 = vpop.f32.mrf.mxu1 }
 0x243   :  { %v772_v22 = vadd.f32 %v771_v50, %v1716_v12  ;;  %v812_v12 = vmax.f32 %v763_v44, 0.0 }
 0x245   :  { %v821_v23 = vmax.f32 %v772_v22, 0.0 }
 0x24a   :  { %v774_v10 = vpop.f32.mrf.mxu1 }
 0x24b   :  { %v775_v0 = vadd.f32 %v774_v10, %v1714_v9  ;;  %v815_v9 = vmax.f32 %v766_v33, 0.0 }
 0x24d   :  { %v824_v59 = vmax.f32 %v775_v0, 0.0 }
 0x252   :  { %v777_v40 = vpop.f32.mrf.mxu1 }
 0x253   :  { %v778_v32 = vadd.f32 %v777_v40, %v1712_v7  ;;  %v757_v7 = vadd.f32 %v756_v4, %v1733_v51  ;;  %v742_v51 = vadd.f32 %v1766_v21, %v1762_v2  ;;  %v782_v2 = vmax.f32 %v733_v62, 0.0 }
 0x255   :  { %v827_v43 = vmax.f32 %v778_v32, 0.0  ;;  %v806_v25 = vmax.f32 %v757_v7, 0.0  ;;  %v791_v28 = vmax.f32 %v742_v51, 0.0 }
 0x257   :  { %875 = vmatpush.msrb.mxu2 %v827_v43 }
 0x259   :  { %876 = vmatpush.msrb.mxu2 %v824_v59 }
 0x25b   :  { %877 = vmatpush.msrb.mxu2 %v821_v23 }
 0x25d   :  { %878 = vmatpush.msrb.mxu2 %v818_v38 }
 0x25f   :  { %879 = vmatpush.msrb.mxu2 %v815_v9 }
 0x261   :  { %880 = vmatpush.msrb.mxu2 %v812_v12 }
 0x263   :  { %881 = vmatpush.msrb.mxu2 %v809_v55 }
 0x265   :  { %882 = vmatpush.msrb.mxu2 %v806_v25 }
 0x267   :  { %883 = vmatpush.msrb.mxu2 %v803_v52 }
 0x269   :  { %884 = vmatpush.msrb.mxu2 %v800_v48 }
 0x26b   :  { %885 = vmatpush.msrb.mxu2 %v797_v46 }
 0x26d   :  { %886 = vmatpush.msrb.mxu2 %v794_v1 }
 0x26f   :  { %887 = vmatpush.msrb.mxu2 %v791_v28 }
 0x271   :  { %888 = vmatpush.msrb.mxu2 %v788_v42 }
 0x273   :  { %889 = vmatpush.msrb.mxu2 %v785_v34 }
 0x275   :  { %890 = vmatpush.msrb.mxu2 %v782_v2 }
 0x276   :  { %891 = vmatmul.f32.vlgmr.msrb.gmra.mxu2 %v1805_v18 }
 0x287   :  { %v872_v21 = vpop.f32.mrf.mxu3 }
 0x288   :  { %v873_v37 = vadd.f32 %v872_v21, %v833_v39 }
 0x28a   :  { %911 = vst [vmem:[#allocation1 + $0x9] sm:$0xff] %v873_v37  ;;  %v898_v24 = vrot.slane %v873_v37, 7 }
 0x28c   :  { %v852_v27 = vpop.f32.mrf.mxu2 }
 0x28d   :  { %v853_v5 = vadd.f32 %v852_v27, %v833_v39 }
 0x28f   :  { %910 = vst [vmem:[#allocation1] sm:$0xff] %v853_v5  ;;  %v901_v54 = vsel %vm900_vm1, %v853_v5, %v898_v24 }
 0x2f9   :  { %v892_v47 = vpop.f32.mrf.mxu2 }
 0x2fa   :  { %v893_v57 = vadd.f32 %v892_v47, %v833_v39 }
 0x2fc   :  { %v899_v31 = vrot.slane %v893_v57, 6  ;;  %912 = vst [vmem:[#allocation1 + $0x12] sm:$0xff] %v893_v57 }
 0x2fe   :  { %v903_v56 = vsel %vm902_vm2, %v901_v54, %v899_v31 }
 0x2ff   :  { %909 = vst.msk [vmem:[#allocation2] sm:$0x7] %vm907_vm3, %v903_v56 }
 0x300   :  { %927 = dma.vmem_to_hbm [thread:$0]  %s923_s22, 48, %s925_s25, [#allocation3]  }
 0x303   :  { %v914_v19 = vld [vmem:[#allocation1 + $0x1] ss:$9 sm:$0xff] }
 0x304   :  { %916 = vst.msk [vmem:[#allocation4] sm:$0x7] %vm907_vm3, %v914_v19 }
 0x305   :  { %938 = dma.vmem_to_hbm [thread:$0]  %s934_s27, 48, %s936_s30, [#allocation5]  }
 0x306   :  { %1059 = dma.done.wait [#allocation3], 48  }
 0x307   :  { %1060 = vsyncadd [#allocation3], 4294967248 }
 0x308   :  { %1061 = dma.done.wait [#allocation5], 48  }
 0x309   :  { %1062 = vsyncadd [#allocation5], 4294967248 }
 0x30a   :  { %947 = vsyncpa [#allocation3], 1 }
 0x30b   :  { %948 = vsyncpa [#allocation5], 1 }

</bundles_post_ra>
